<compile_context>
chip_gen: v7x
topology: tpu7x:2x2x1
jax: 0.10.0
libtpu: 0.0.40
codegen_flags: <defaults>
</compile_context>

<pallas_src>
import functools

import jax
import jax.numpy as jnp
from jax.experimental import pallas as pl
from jax.experimental.pallas import tpu as pltpu


def _round_up(n: int, m: int) -> int:
    return ((n + m - 1) // m) * m


def _mlp_kernel(
    x_ref,
    w1_ref, b1_ref,
    w2_ref, b2_ref,
    w3_ref, b3_ref,
    w4_ref, b4_ref,
    w5_ref, b5_ref,
    out_ref,
    *, binary: bool,
):
    x = x_ref[...]  # (TB, Kp) bf16

    # fc1 + relu  (dropout1 == identity at inference)
    h1 = jnp.dot(x, w1_ref[...], preferred_element_type=jnp.float32) + b1_ref[...]
    h1 = jnp.maximum(h1, 0.0).astype(jnp.bfloat16)

    # fc2 + relu  (dropout2 == identity at inference)
    h2 = jnp.dot(h1, w2_ref[...], preferred_element_type=jnp.float32) + b2_ref[...]
    h2 = jnp.maximum(h2, 0.0).astype(jnp.bfloat16)

    # Attention over a length-1 sequence: softmax == 1, context == h2.
    # The (128 -> 1) attention matmul is dead compute and is omitted here;
    # the wrapper returns attention_weights == ones.

    # fc3 + relu
    h3 = jnp.dot(h2, w3_ref[...], preferred_element_type=jnp.float32) + b3_ref[...]
    h3 = jnp.maximum(h3, 0.0).astype(jnp.bfloat16)

    # fc4 + relu
    h4 = jnp.dot(h3, w4_ref[...], preferred_element_type=jnp.float32) + b4_ref[...]
    h4 = jnp.maximum(h4, 0.0).astype(jnp.bfloat16)

    # fc5 (+ sigmoid for binary task)
    y = jnp.dot(h4, w5_ref[...], preferred_element_type=jnp.float32) + b5_ref[...]
    if binary:
        y = jax.nn.sigmoid(y)

    out_ref[...] = y


def init_params(key, input_dim):
    """Deterministic parameter init mimicking torch Linear default (uniform in
    [-1/sqrt(fan_in), 1/sqrt(fan_in)]).  Weights stored pre-transposed (in, out);
    biases as (1, out).  Includes the attention Linear (wa, ba) for parity with
    the torch module even though it is dead for the forward value."""
    dims = [(input_dim, 256), (256, 128), (128, 1), (128, 64), (64, 32), (32, 1)]
    params = []
    for (fan_in, fan_out) in dims:
        key, kw, kb = jax.random.split(key, 3)
        bound = 1.0 / jnp.sqrt(float(fan_in))
        w = jax.random.uniform(kw, (fan_in, fan_out), jnp.float32, -bound, bound)
        b = jax.random.uniform(kb, (1, fan_out), jnp.float32, -bound, bound)
        params += [w, b]
    return tuple(params)


@functools.partial(jax.jit, static_argnames=("task", "block_batch"))
def neural_network_forward(x, params, task="binary", block_batch=512):
    (w1, b1, w2, b2, wa, ba, w3, b3, w4, b4, w5, b5) = params
    del wa, ba  # dead parameters for the forward value (length-1 softmax == 1)

    B, K = x.shape
    Kp = _round_up(max(K, 1), 128)             # lane-align fc1's K dimension
    tb = _round_up(min(block_batch, _round_up(B, 16)), 16)   # batch tile
    Bp = _round_up(B, tb)                       # padded batch (zero rows)

    # Zero-pad + cast matmul inputs to bf16 (weights resident in VMEM in bf16).
    xp = jnp.zeros((Bp, Kp), jnp.bfloat16).at[:B, :K].set(x.astype(jnp.bfloat16))
    w1p = jnp.zeros((Kp, 256), jnp.bfloat16).at[:K, :].set(w1.astype(jnp.bfloat16))
    w2b = w2.astype(jnp.bfloat16)
    w3b = w3.astype(jnp.bfloat16)
    w4b = w4.astype(jnp.bfloat16)
    w5b = w5.astype(jnp.bfloat16)

    grid = (Bp // tb,)
    const = lambda i: (0, 0)   # weights/biases stay resident across grid steps

    in_specs = [
        pl.BlockSpec((tb, Kp), lambda i: (i, 0)),   # x tile
        pl.BlockSpec((Kp, 256), const), pl.BlockSpec((1, 256), const),   # fc1
        pl.BlockSpec((256, 128), const), pl.BlockSpec((1, 128), const),  # fc2
        pl.BlockSpec((128, 64), const), pl.BlockSpec((1, 64), const),    # fc3
        pl.BlockSpec((64, 32), const), pl.BlockSpec((1, 32), const),     # fc4
        pl.BlockSpec((32, 1), const), pl.BlockSpec((1, 1), const),       # fc5
    ]
    out_specs = pl.BlockSpec((tb, 1), lambda i: (i, 0))

    binary = (task == "binary")
    flops = 2 * Bp * (Kp * 256 + 256 * 128 + 128 * 64 + 64 * 32 + 32 * 1)
    weight_bytes = 2 * (Kp * 256 + 256 * 128 + 128 * 64 + 64 * 32 + 32) \
        + 4 * (256 + 128 + 64 + 32 + 1)
    cost = pl.CostEstimate(
        flops=flops,
        transcendentals=Bp if binary else 0,
        bytes_accessed=Bp * Kp * 2 + weight_bytes + Bp * 4,
    )

    y = pl.pallas_call(
        functools.partial(_mlp_kernel, binary=binary),
        out_shape=jax.ShapeDtypeStruct((Bp, 1), jnp.float32),
        grid=grid,
        in_specs=in_specs,
        out_specs=out_specs,
        compiler_params=pltpu.CompilerParams(
            dimension_semantics=("parallel",),
            vmem_limit_bytes=32 * 1024 * 1024,
        ),
        cost_estimate=cost,
    )(xp, w1p, b1, w2b, b2, w3b, b3, w4b, b4, w5b, b5)

    y = y[:B]
    # softmax over a length-1 sequence axis is identically 1.0
    attn_w = jnp.ones((B, 1, 1), jnp.float32)
    return y, attn_w


def _reference_forward(x, params, task="binary"):
    """Pure-JAX reference (including the dead attention branch), mirroring the
    kernel's bf16-matmul / f32-accumulate numerics."""
    (w1, b1, w2, b2, wa, ba, w3, b3, w4, b4, w5, b5) = params
    bf = lambda a: a.astype(jnp.bfloat16)
    h1 = jnp.maximum(jnp.dot(bf(x), bf(w1), preferred_element_type=jnp.float32) + b1, 0.0)
    h2 = jnp.maximum(jnp.dot(bf(h1), bf(w2), preferred_element_type=jnp.float32) + b2, 0.0)
    logits = (jnp.dot(bf(h2), bf(wa), preferred_element_type=jnp.float32) + ba)[:, None, :]
    attn_w = jax.nn.softmax(logits, axis=1)          # (B, 1, 1) -> all ones
    ctx = jnp.sum(h2[:, None, :] * attn_w, axis=1)   # == h2
    h3 = jnp.maximum(jnp.dot(bf(ctx), bf(w3), preferred_element_type=jnp.float32) + b3, 0.0)
    h4 = jnp.maximum(jnp.dot(bf(h3), bf(w4), preferred_element_type=jnp.float32) + b4, 0.0)
    y = jnp.dot(bf(h4), bf(w5), preferred_element_type=jnp.float32) + b5
    if task == "binary":
        y = jax.nn.sigmoid(y)
    return y, attn_w


if __name__ == "__main__":
    batch = 8
    input_dim = 32
    task = "binary"

    key = jax.random.PRNGKey(0)
    key, kx = jax.random.split(key)
    x = jax.random.normal(kx, (batch, input_dim), jnp.float32)
    params = init_params(key, input_dim)

    y, attn_w = neural_network_forward(x, params, task=task)
    jax.block_until_ready((y, attn_w))

    y_ref, attn_ref = _reference_forward(x, params, task=task)
    assert y.shape == (batch, 1)
    assert attn_w.shape == (batch, 1, 1)
    assert jnp.allclose(y, y_ref, atol=2e-3, rtol=2e-3)
    assert jnp.allclose(attn_w, attn_ref, atol=1e-6)

    print("KERNEL_OK")
</pallas_src>

<mosaic_0001>
module attributes {stable_mosaic.version = 11 : i64} {
  func.func @_mlp_kernel(%arg0: i32, %arg1: memref<16x128xbf16, #tpu.memory_space<vmem>>, %arg2: memref<128x256xbf16, #tpu.memory_space<vmem>>, %arg3: memref<1x256xf32, #tpu.memory_space<vmem>>, %arg4: memref<256x128xbf16, #tpu.memory_space<vmem>>, %arg5: memref<1x128xf32, #tpu.memory_space<vmem>>, %arg6: memref<128x64xbf16, #tpu.memory_space<vmem>>, %arg7: memref<1x64xf32, #tpu.memory_space<vmem>>, %arg8: memref<64x32xbf16, #tpu.memory_space<vmem>>, %arg9: memref<1x32xf32, #tpu.memory_space<vmem>>, %arg10: memref<32x1xbf16, #tpu.memory_space<vmem>>, %arg11: memref<1x1xf32, #tpu.memory_space<vmem>>, %arg12: memref<16x1xf32, #tpu.memory_space<vmem>>) attributes {dimension_semantics = [#tpu.dimension_semantics<parallel>], iteration_bounds = array<i64: 1>, scalar_prefetch = 0 : i64, scratch_operands = 0 : i64, tpu.core_type = #tpu.core_type<tc>, window_params = [{transform_indices = @transform_0, window_bounds = array<i64: 16, 128>}, {pipeline_mode = #tpu.pipeline_mode<synchronous>, transform_indices = @transform_1, window_bounds = array<i64: 128, 256>}, {pipeline_mode = #tpu.pipeline_mode<synchronous>, transform_indices = @transform_2, window_bounds = array<i64: 1, 256>}, {pipeline_mode = #tpu.pipeline_mode<synchronous>, transform_indices = @transform_3, window_bounds = array<i64: 256, 128>}, {pipeline_mode = #tpu.pipeline_mode<synchronous>, transform_indices = @transform_4, window_bounds = array<i64: 1, 128>}, {pipeline_mode = #tpu.pipeline_mode<synchronous>, transform_indices = @transform_5, window_bounds = array<i64: 128, 64>}, {pipeline_mode = #tpu.pipeline_mode<synchronous>, transform_indices = @transform_6, window_bounds = array<i64: 1, 64>}, {pipeline_mode = #tpu.pipeline_mode<synchronous>, transform_indices = @transform_7, window_bounds = array<i64: 64, 32>}, {pipeline_mode = #tpu.pipeline_mode<synchronous>, transform_indices = @transform_8, window_bounds = array<i64: 1, 32>}, {pipeline_mode = #tpu.pipeline_mode<synchronous>, transform_indices = @transform_9, window_bounds = array<i64: 32, 1>}, {pipeline_mode = #tpu.pipeline_mode<synchronous>, transform_indices = @transform_10, window_bounds = array<i64: 1, 1>}, {transform_indices = @transform_11, window_bounds = array<i64: 16, 1>}]} {
    %c0 = arith.constant 0 : index
    %c0_0 = arith.constant 0 : index
    %0 = vector.load %arg1[%c0, %c0_0] : memref<16x128xbf16, #tpu.memory_space<vmem>>, vector<16x128xbf16>
    %c0_1 = arith.constant 0 : index
    %c0_2 = arith.constant 0 : index
    %1 = vector.load %arg2[%c0_1, %c0_2] : memref<128x256xbf16, #tpu.memory_space<vmem>>, vector<128x256xbf16>
    %cst = arith.constant dense<0.000000e+00> : vector<16x256xf32>
    %2 = tpu.matmul %0, %1, %cst {dimension_numbers = #tpu.dot_dimension_numbers<[1], [0], [0], [1], [0, 0, 1, 1], [], []>} : vector<16x128xbf16>, vector<128x256xbf16>, vector<16x256xf32> -> vector<16x256xf32>
    %c0_3 = arith.constant 0 : index
    %c0_4 = arith.constant 0 : index
    %3 = vector.load %arg3[%c0_3, %c0_4] : memref<1x256xf32, #tpu.memory_space<vmem>>, vector<1x256xf32>
    %4 = vector.broadcast %3 : vector<1x256xf32> to vector<16x256xf32>
    %5 = arith.addf %2, %4 : vector<16x256xf32>
    %cst_5 = arith.constant 0.000000e+00 : f32
    %6 = vector.broadcast %cst_5 : f32 to vector<16x256xf32>
    %7 = arith.maximumf %5, %6 : vector<16x256xf32>
    %8 = arith.truncf %7 : vector<16x256xf32> to vector<16x256xbf16>
    %c0_6 = arith.constant 0 : index
    %c0_7 = arith.constant 0 : index
    %9 = vector.load %arg4[%c0_6, %c0_7] : memref<256x128xbf16, #tpu.memory_space<vmem>>, vector<256x128xbf16>
    %cst_8 = arith.constant dense<0.000000e+00> : vector<16x128xf32>
    %10 = tpu.matmul %8, %9, %cst_8 {dimension_numbers = #tpu.dot_dimension_numbers<[1], [0], [0], [1], [0, 0, 1, 1], [], []>} : vector<16x256xbf16>, vector<256x128xbf16>, vector<16x128xf32> -> vector<16x128xf32>
    %c0_9 = arith.constant 0 : index
    %c0_10 = arith.constant 0 : index
    %11 = vector.load %arg5[%c0_9, %c0_10] : memref<1x128xf32, #tpu.memory_space<vmem>>, vector<1x128xf32>
    %12 = vector.broadcast %11 : vector<1x128xf32> to vector<16x128xf32>
    %13 = arith.addf %10, %12 : vector<16x128xf32>
    %cst_11 = arith.constant 0.000000e+00 : f32
    %14 = vector.broadcast %cst_11 : f32 to vector<16x128xf32>
    %15 = arith.maximumf %13, %14 : vector<16x128xf32>
    %16 = arith.truncf %15 : vector<16x128xf32> to vector<16x128xbf16>
    %c0_12 = arith.constant 0 : index
    %c0_13 = arith.constant 0 : index
    %17 = vector.load %arg6[%c0_12, %c0_13] : memref<128x64xbf16, #tpu.memory_space<vmem>>, vector<128x64xbf16>
    %cst_14 = arith.constant dense<0.000000e+00> : vector<16x64xf32>
    %18 = tpu.matmul %16, %17, %cst_14 {dimension_numbers = #tpu.dot_dimension_numbers<[1], [0], [0], [1], [0, 0, 1, 1], [], []>} : vector<16x128xbf16>, vector<128x64xbf16>, vector<16x64xf32> -> vector<16x64xf32>
    %c0_15 = arith.constant 0 : index
    %c0_16 = arith.constant 0 : index
    %19 = vector.load %arg7[%c0_15, %c0_16] : memref<1x64xf32, #tpu.memory_space<vmem>>, vector<1x64xf32>
    %20 = vector.broadcast %19 : vector<1x64xf32> to vector<16x64xf32>
    %21 = arith.addf %18, %20 : vector<16x64xf32>
    %cst_17 = arith.constant 0.000000e+00 : f32
    %22 = vector.broadcast %cst_17 : f32 to vector<16x64xf32>
    %23 = arith.maximumf %21, %22 : vector<16x64xf32>
    %24 = arith.truncf %23 : vector<16x64xf32> to vector<16x64xbf16>
    %c0_18 = arith.constant 0 : index
    %c0_19 = arith.constant 0 : index
    %25 = vector.load %arg8[%c0_18, %c0_19] : memref<64x32xbf16, #tpu.memory_space<vmem>>, vector<64x32xbf16>
    %cst_20 = arith.constant dense<0.000000e+00> : vector<16x32xf32>
    %26 = tpu.matmul %24, %25, %cst_20 {dimension_numbers = #tpu.dot_dimension_numbers<[1], [0], [0], [1], [0, 0, 1, 1], [], []>} : vector<16x64xbf16>, vector<64x32xbf16>, vector<16x32xf32> -> vector<16x32xf32>
    %c0_21 = arith.constant 0 : index
    %c0_22 = arith.constant 0 : index
    %27 = vector.load %arg9[%c0_21, %c0_22] : memref<1x32xf32, #tpu.memory_space<vmem>>, vector<1x32xf32>
    %28 = vector.broadcast %27 : vector<1x32xf32> to vector<16x32xf32>
    %29 = arith.addf %26, %28 : vector<16x32xf32>
    %cst_23 = arith.constant 0.000000e+00 : f32
    %30 = vector.broadcast %cst_23 : f32 to vector<16x32xf32>
    %31 = arith.maximumf %29, %30 : vector<16x32xf32>
    %32 = arith.truncf %31 : vector<16x32xf32> to vector<16x32xbf16>
    %c0_24 = arith.constant 0 : index
    %c0_25 = arith.constant 0 : index
    %33 = vector.load %arg10[%c0_24, %c0_25] : memref<32x1xbf16, #tpu.memory_space<vmem>>, vector<32x1xbf16>
    %cst_26 = arith.constant dense<0.000000e+00> : vector<16x1xf32>
    %34 = tpu.matmul %32, %33, %cst_26 {dimension_numbers = #tpu.dot_dimension_numbers<[1], [0], [0], [1], [0, 0, 1, 1], [], []>} : vector<16x32xbf16>, vector<32x1xbf16>, vector<16x1xf32> -> vector<16x1xf32>
    %c0_27 = arith.constant 0 : index
    %c0_28 = arith.constant 0 : index
    %35 = vector.load %arg11[%c0_27, %c0_28] : memref<1x1xf32, #tpu.memory_space<vmem>>, vector<1x1xf32>
    %36 = vector.broadcast %35 : vector<1x1xf32> to vector<16x1xf32>
    %37 = arith.addf %34, %36 : vector<16x1xf32>
    %38 = arith.negf %37 : vector<16x1xf32>
    %39 = math.exp %38 : vector<16x1xf32>
    %cst_29 = arith.constant 1.000000e+00 : f32
    %40 = vector.broadcast %cst_29 : f32 to vector<16x1xf32>
    %41 = arith.addf %40, %39 : vector<16x1xf32>
    %42 = arith.divf %40, %41 : vector<16x1xf32>
    %c0_30 = arith.constant 0 : index
    %c0_31 = arith.constant 0 : index
    %43 = vector.load %arg12[%c0_30, %c0_31] : memref<16x1xf32, #tpu.memory_space<vmem>>, vector<16x1xf32>
    tpu.vector_store %arg12[%c0_30, %c0_31], %42 {strides = array<i32>} : memref<16x1xf32, #tpu.memory_space<vmem>>, vector<16x1xf32>,
    return
  }
  func.func @transform_0(%arg0: i32) -> (i32, i32) {
    %c0_i32 = arith.constant 0 : i32
    %c0_i32_0 = arith.constant 0 : i32
    return %arg0, %c0_i32 : i32, i32
  }
  func.func @transform_1(%arg0: i32) -> (i32, i32) {
    %c0_i32 = arith.constant 0 : i32
    %c0_i32_0 = arith.constant 0 : i32
    %c0_i32_1 = arith.constant 0 : i32
    return %c0_i32, %c0_i32_0 : i32, i32
  }
  func.func @transform_2(%arg0: i32) -> (i32, i32) {
    %c0_i32 = arith.constant 0 : i32
    %c0_i32_0 = arith.constant 0 : i32
    %c0_i32_1 = arith.constant 0 : i32
    return %c0_i32, %c0_i32_0 : i32, i32
  }
  func.func @transform_3(%arg0: i32) -> (i32, i32) {
    %c0_i32 = arith.constant 0 : i32
    %c0_i32_0 = arith.constant 0 : i32
    %c0_i32_1 = arith.constant 0 : i32
    return %c0_i32, %c0_i32_0 : i32, i32
  }
  func.func @transform_4(%arg0: i32) -> (i32, i32) {
    %c0_i32 = arith.constant 0 : i32
    %c0_i32_0 = arith.constant 0 : i32
    %c0_i32_1 = arith.constant 0 : i32
    return %c0_i32, %c0_i32_0 : i32, i32
  }
  func.func @transform_5(%arg0: i32) -> (i32, i32) {
    %c0_i32 = arith.constant 0 : i32
    %c0_i32_0 = arith.constant 0 : i32
    %c0_i32_1 = arith.constant 0 : i32
    return %c0_i32, %c0_i32_0 : i32, i32
  }
  func.func @transform_6(%arg0: i32) -> (i32, i32) {
    %c0_i32 = arith.constant 0 : i32
    %c0_i32_0 = arith.constant 0 : i32
    %c0_i32_1 = arith.constant 0 : i32
    return %c0_i32, %c0_i32_0 : i32, i32
  }
  func.func @transform_7(%arg0: i32) -> (i32, i32) {
    %c0_i32 = arith.constant 0 : i32
    %c0_i32_0 = arith.constant 0 : i32
    %c0_i32_1 = arith.constant 0 : i32
    return %c0_i32, %c0_i32_0 : i32, i32
  }
  func.func @transform_8(%arg0: i32) -> (i32, i32) {
    %c0_i32 = arith.constant 0 : i32
    %c0_i32_0 = arith.constant 0 : i32
    %c0_i32_1 = arith.constant 0 : i32
    return %c0_i32, %c0_i32_0 : i32, i32
  }
  func.func @transform_9(%arg0: i32) -> (i32, i32) {
    %c0_i32 = arith.constant 0 : i32
    %c0_i32_0 = arith.constant 0 : i32
    %c0_i32_1 = arith.constant 0 : i32
    return %c0_i32, %c0_i32_0 : i32, i32
  }
  func.func @transform_10(%arg0: i32) -> (i32, i32) {
    %c0_i32 = arith.constant 0 : i32
    %c0_i32_0 = arith.constant 0 : i32
    %c0_i32_1 = arith.constant 0 : i32
    return %c0_i32, %c0_i32_0 : i32, i32
  }
  func.func @transform_11(%arg0: i32) -> (i32, i32) {
    %c0_i32 = arith.constant 0 : i32
    %c0_i32_0 = arith.constant 0 : i32
    return %arg0, %c0_i32 : i32, i32
  }
}

</mosaic_0001>

<bundles_post_ra>
// kernel: neural_network_forward.1
= control target key start
LH: loop header
LB: loop body
LE: loop exit
PB: predicated region body
PF: predicated region fallthrough
CT: control target
= control target key end

     0   :  { %v874_v1 = vmov 0   ;;  %v875_v34 = vmov 0.0   ;;  %v61_v40 = vlaneseq  ;;  %vm876_vm0 = vmmov 0   ;;  %s1119_s1 = inlined_call_operand.vmem [shape: bf16[128,256], index: 1, kind: input, shape index: {}]   ;;  %s1120_s0 = inlined_call_operand.vmem [shape: bf16[16,128], index: 0, kind: input, shape index: {}]   ;;  %s1121_s3 = inlined_call_operand.vmem [shape: bf16[256,128], index: 3, kind: input, shape index: {}]   ;;  %s1122_s5 = inlined_call_operand.vmem [shape: bf16[128,64], index: 5, kind: input, shape index: {}]   ;;  %s1123_s2 = inlined_call_operand.vmem [shape: f32[1,256], index: 2, kind: input, shape index: {}]   ;;  %s1124_s7 = inlined_call_operand.vmem [shape: bf16[64,32], index: 7, kind: input, shape index: {}]   ;;  %s1125_s4 = inlined_call_operand.vmem [shape: f32[1,128], index: 4, kind: input, shape index: {}]   ;;  %s1126_s6 = inlined_call_operand.vmem [shape: f32[1,64], index: 6, kind: input, shape index: {}]   ;;  %s1127_s9 = inlined_call_operand.vmem [shape: bf16[32,1], index: 9, kind: input, shape index: {}]   ;;  %s1128_s10 = inlined_call_operand.<no memory space> [shape: f32[1,1], index: 10, kind: input, shape index: {}]   ;;  %s1129_s8 = inlined_call_operand.vmem [shape: f32[1,32], index: 8, kind: input, shape index: {}]   ;;  %s1130_s11 = inlined_call_operand.vmem [shape: f32[16,1], index: 11, kind: output, shape index: {}]  }
   0x1   :  { %v811_v0 = vld [vmem:[%s1119_s1 + $0x4] ss:$8 sps:$4 sm:$0xff]   ;;  %189 = vmatprep.mubr.bf16.mxu0 %v874_v1  ;;  %v813_v2 = vld [vmem:[%s1119_s1] ss:$8 sps:$4 sm:$0xff]   ;;  %v814_v3 = vld [vmem:[%s1119_s1 + $0x14] ss:$8 sps:$4 sm:$0xff]  }
   0x2   :  { %157 = vmatprep.subr.bf16.mxu0 %v811_v0  ;;  %v816_v4 = vld [vmem:[%s1119_s1 + $0x10] ss:$8 sps:$4 sm:$0xff]   ;;  %v817_v5 = vld [vmem:[%s1119_s1 + $0x24] ss:$8 sps:$4 sm:$0xff]   ;;  %v819_v6 = vld [vmem:[%s1119_s1 + $0x20] ss:$8 sps:$4 sm:$0xff]  }
   0x3   :  { %158 = vmatpush1.bf16.msra.mxu0 %v813_v2  ;;  %v820_v7 = vld [vmem:[%s1119_s1 + $0x34] ss:$8 sps:$4 sm:$0xff]   ;;  %v822_v8 = vld [vmem:[%s1119_s1 + $0x30] ss:$8 sps:$4 sm:$0xff]   ;;  %v823_v9 = vld [vmem:[%s1119_s1 + $0x44] ss:$8 sps:$4 sm:$0xff]  }
   0x4   :  { %159 = vmatprep.subr.bf16.mxu0 %v814_v3  ;;  %v836_v10 = vld [vmem:[%s1121_s3 + $0x40] sm:$0xff]   ;;  %v826_v13 = vld [vmem:[%s1119_s1 + $0x54] ss:$8 sps:$4 sm:$0xff]   ;;  %v838_v14 = vld [vmem:[%s1121_s3 + $0x48] sm:$0xff]   ;;  %v62_v41 = vshrl.u32 %v61_v40, 7  ;;  %vm539_vm1 = vcmask 523264  }
   0x5   :  { %v825_v11 = vld [vmem:[%s1119_s1 + $0x40] ss:$8 sps:$4 sm:$0xff]   ;;  %729 = vmatprep.subr.bf16.mxu1 %v836_v10  ;;  %v840_v16 = vld [vmem:[%s1121_s3 + $0x50] sm:$0xff]   ;;  %v829_v18 = vld [vmem:[%s1119_s1 + $0x64] ss:$8 sps:$4 sm:$0xff]   ;;  %vm610_vm2 = vcmask 261120  }
   0x6   :  { %v837_v12 = vld [vmem:[%s1121_s3] sm:$0xff]   ;;  %v839_v15 = vld [vmem:[%s1121_s3 + $0x8] sm:$0xff]   ;;  %v828_v17 = vld [vmem:[%s1119_s1 + $0x50] ss:$8 sps:$4 sm:$0xff]   ;;  %v63_v42 = vsub.s32 0, %v62_v41  ;;  %v67_v44 = vsub.s32 1, %v62_v41 }
   0x7   :  { %160 = vmatpush1.bf16.msra.mxu0 %v816_v4  ;;  %730 = vmatpush3.bf16.msra.mxu1 %v837_v12  ;;  %v841_v19 = vld [vmem:[%s1121_s3 + $0x10] sm:$0xff]   ;;  %v842_v20 = vld [vmem:[%s1121_s3 + $0x58] sm:$0xff]   ;;  %v831_v21 = vld [vmem:[%s1119_s1 + $0x60] ss:$8 sps:$4 sm:$0xff]   ;;  %vm667_vm3 = vcmask 7168  }
   0x8   :  { %161 = vmatprep.subr.bf16.mxu0 %v817_v5  ;;  %731 = vmatprep.subr.bf16.mxu1 %v838_v14  ;;  %v832_v22 = vld [vmem:[%s1119_s1 + $0x74] ss:$8 sps:$4 sm:$0xff]   ;;  %v844_v24 = vld [vmem:[%s1121_s3 + $0x60] sm:$0xff]   ;;  %v834_v25 = vld [vmem:[%s1119_s1 + $0x70] ss:$8 sps:$4 sm:$0xff]  }
   0x9   :  { %v843_v23 = vld [vmem:[%s1121_s3 + $0x18] sm:$0xff]   ;;  %v845_v26 = vld [vmem:[%s1121_s3 + $0x20] sm:$0xff]   ;;  %v846_v27 = vld [vmem:[%s1121_s3 + $0x68] sm:$0xff]  }
   0xa   :  { %v835_v28 = vld [vmem:[%s1120_s0] sm:$0xff]   ;;  %v847_v29 = vld [vmem:[%s1121_s3 + $0x28] sm:$0xff]   ;;  %v848_v30 = vld [vmem:[%s1121_s3 + $0x70] sm:$0xff]  }
   0xb   :  { %162 = vmatpush1.bf16.msra.mxu0 %v819_v6  ;;  %732 = vmatpush3.bf16.msra.mxu1 %v839_v15  ;;  %v849_v31 = vld [vmem:[%s1121_s3 + $0x30] sm:$0xff]   ;;  %v850_v32 = vld [vmem:[%s1121_s3 + $0x78] sm:$0xff]   ;;  %v852_v35 = vld [vmem:[%s1122_s5] sm:$0xff]  }
   0xc   :  { %163 = vmatprep.subr.bf16.mxu0 %v820_v7  ;;  %733 = vmatprep.subr.bf16.mxu1 %v840_v16  ;;  %v851_v33 = vld [vmem:[%s1121_s3 + $0x38] sm:$0xff]   ;;  %v853_v36 = vld [vmem:[%s1122_s5 + $0x8] sm:$0xff]   ;;  %v854_v37 = vld [vmem:[%s1122_s5 + $0x10] sm:$0xff]  }
   0xd   :  { %v855_v38 = vld [vmem:[%s1122_s5 + $0x18] sm:$0xff]   ;;  %v856_v39 = vld [vmem:[%s1122_s5 + $0x20] sm:$0xff]   ;;  %v857_v61 = vld [vmem:[%s1122_s5 + $0x28] sm:$0xff]  }
   0xe   :  { %v59_v43 = vld [vmem:[%s1123_s2] sm:$0x3]  ;;  %v858_v62 = vld [vmem:[%s1122_s5 + $0x30] sm:$0xff]   ;;  %v859_v63 = vld [vmem:[%s1122_s5 + $0x38] sm:$0xff]  }
   0xf   :  { %164 = vmatpush1.bf16.msra.mxu0 %v822_v8  ;;  %734 = vmatpush3.bf16.msra.mxu1 %v841_v19  ;;  %v64_v45 = vrot.slane %v59_v43, %v63_v42  ;;  %v68_v46 = vrot.slane %v59_v43, %v67_v44  ;;  %v860_v0 = vld [vmem:[%s1124_s7] sm:$0xff]   ;;  %v861_v1 = vld [vmem:[%s1124_s7 + $0x8] sm:$0xff]   ;;  %v862_v14 = vld [vmem:[%s1124_s7 + $0x10] sm:$0xff]  }
  0x10   :  { %165 = vmatprep.subr.bf16.mxu0 %v823_v9  ;;  %735 = vmatprep.subr.bf16.mxu1 %v842_v20  ;;  %v691_v3 = vld [vmem:[%s1125_s4] ss:$0 sm:$0xff]  ;;  %v863_v15 = vld [vmem:[%s1124_s7 + $0x18] sm:$0xff]  }
  0x11   :  { %v708_v16 = vld [vmem:[%s1126_s6] ss:$0 sm:$0xff] }
  0x13   :  { %166 = vmatpush1.bf16.msra.mxu0 %v825_v11  ;;  %736 = vmatpush3.bf16.msra.mxu1 %v843_v23 }
  0x14   :  { %167 = vmatprep.subr.bf16.mxu0 %v826_v13  ;;  %737 = vmatprep.subr.bf16.mxu1 %v844_v24 }
  0x17   :  { %168 = vmatpush1.bf16.msra.mxu0 %v828_v17  ;;  %738 = vmatpush3.bf16.msra.mxu1 %v845_v26  ;;  %v864_v26 = vld [vmem:[%s1127_s9] sm:$0xff]  }
  0x18   :  { %169 = vmatprep.subr.bf16.mxu0 %v829_v18  ;;  %739 = vmatprep.subr.bf16.mxu1 %v846_v27  ;;  %v865_v27 = vld [vmem:[%s1127_s9 + $0x8] sm:$0xff]  }
  0x1b   :  { %170 = vmatpush1.bf16.msra.mxu0 %v831_v21  ;;  %740 = vmatpush3.bf16.msra.mxu1 %v847_v29  ;;  %v717_v29 = vld [vmem:[%s1129_s8] ss:$0 sm:$0xff] }
  0x1c   :  { %171 = vmatprep.subr.bf16.mxu0 %v832_v22  ;;  %741 = vmatprep.subr.bf16.mxu1 %v848_v30 }
  0x1f   :  { %172 = vmatpush1.bf16.msra.mxu0 %v834_v25  ;;  %742 = vmatpush3.bf16.msra.mxu1 %v849_v31 }
  0x20   :  { %743 = vmatprep.subr.bf16.mxu1 %v850_v32  ;;  %768 = vmatprep.subr.bf16.mxu0 %v875_v34 }
  0x22   :  { %190 = vmatmul.mubr.bf16.vlgmr.msra.gmra.mrb[0].mxu0 %v835_v28  ;;  %v16_v28 = vstv %s1128_s10 }
  0x23   :  { %744 = vmatpush3.bf16.msra.mxu1 %v851_v33  ;;  %769 = vmatpush3.bf16.msra.mxu0 %v852_v35  ;;  %17 = vst [vmem:[#allocation2] sm:$0x1] %v16_v28 }
  0x24   :  { %788 = vmatprep.subr.bf16.mxu1 %v875_v34  ;;  %770 = vmatprep.subr.bf16.mxu0 %v875_v34 }
  0x25   :  { %784 = vmatprep.mubr.msk.bf16.mxu0 %vm876_vm0, %v875_v34 }
  0x27   :  { %771 = vmatpush3.bf16.msra.mxu0 %v853_v36 }
  0x28   :  { %772 = vmatprep.subr.bf16.mxu0 %v875_v34 }
  0x2b   :  { %773 = vmatpush3.bf16.msra.mxu0 %v854_v37 }
  0x2c   :  { %774 = vmatprep.subr.bf16.mxu0 %v875_v34 }
  0x2f   :  { %775 = vmatpush3.bf16.msra.mxu0 %v855_v38 }
  0x30   :  { %776 = vmatprep.subr.bf16.mxu0 %v875_v34 }
  0x33   :  { %777 = vmatpush3.bf16.msra.mxu0 %v856_v39  ;;  %v723_v39 = vld [vmem:[#allocation2] ss:$0 sm:$0xff] }
  0x34   :  { %778 = vmatprep.subr.bf16.mxu0 %v875_v34 }
  0x37   :  { %779 = vmatpush3.bf16.msra.mxu0 %v857_v61 }
  0x38   :  { %780 = vmatprep.subr.bf16.mxu0 %v875_v34 }
  0x3b   :  { %781 = vmatpush3.bf16.msra.mxu0 %v858_v62 }
  0x3c   :  { %782 = vmatprep.subr.bf16.mxu0 %v875_v34 }
  0x3f   :  { %783 = vmatpush3.bf16.msra.mxu0 %v859_v63 }
  0xf5   :  { %v191_v47 = vpop.f32.mrb[0].mxu0 }
  0xf6   :  { %v192_v48 = vadd.f32 %v191_v47, %v64_v45  ;;  %v193_v49 = vpop.f32.mrb[1].mxu0 }
  0xf7   :  { %v194_v50 = vadd.f32 %v193_v49, %v68_v46  ;;  %v195_v51 = vpop.f32.mrb[2].mxu0 }
  0xf8   :  { %v196_v52 = vadd.f32 %v195_v51, %v64_v45  ;;  %v197_v53 = vpop.f32.mrb[3].mxu0  ;;  %v200_v55 = vmax.f32 %v192_v48, 0.0 }
  0xf9   :  { %v198_v54 = vadd.f32 %v197_v53, %v68_v46  ;;  %v201_v57 = vmax.f32 %v194_v50, 0.0 }
  0xfa   :  { %v202_v56 = vmax.f32 %v196_v52, 0.0 }
  0xfb   :  { %v203_v58 = vmax.f32 %v198_v54, 0.0 }
  0xfc   :  { %v204_v59 = vpack.c.bf16 %v202_v56, %v200_v55 }
  0xfd   :  { %v205_v60 = vpack.c.bf16 %v203_v58, %v201_v57 }
  0xff   :  { %373 = vmatprep.mubr.bf16.mxu1 %v205_v60 }
 0x100   :  { %374 = vmatmul.mubr.bf16.vlgmr.msra.gmra.mrb[0].mxu1 %v204_v59 }
 0x101   :  { %796 = vmatprep.mubr.msk.bf16.mxu1 %vm876_vm0, %v875_v34  ;;  %789 = vmatpush3.bf16.msra.mxu1 %v860_v0 }
 0x102   :  { %790 = vmatprep.subr.bf16.mxu1 %v875_v34 }
 0x105   :  { %791 = vmatpush3.bf16.msra.mxu1 %v861_v1 }
 0x106   :  { %792 = vmatprep.subr.bf16.mxu1 %v875_v34 }
 0x109   :  { %793 = vmatpush3.bf16.msra.mxu1 %v862_v14 }
 0x10a   :  { %794 = vmatprep.subr.bf16.mxu1 %v875_v34 }
 0x10d   :  { %795 = vmatpush3.bf16.msra.mxu1 %v863_v15 }
 0x10e   :  { %800 = vmatprep.subr.bf16.mxu1 %v875_v34 }
 0x1d3   :  { %v745_v2 = vpop.f32.mrb[0].mxu1 }
 0x1d4   :  { %v746_v4 = vpop.f32.mrb[1].mxu1 }
 0x1d5   :  { %v747_v5 = vadd.f32 %v746_v4, %v745_v2  ;;  %v748_v6 = vpop.f32.mrb[2].mxu1 }
 0x1d6   :  { %v749_v7 = vpop.f32.mrb[3].mxu1 }
 0x1d7   :  { %v376_v8 = vadd.f32 %v747_v5, %v691_v3  ;;  %v750_v9 = vadd.f32 %v749_v7, %v748_v6 }
 0x1d9   :  { %v379_v10 = vadd.f32 %v750_v9, %v691_v3  ;;  %v382_v11 = vmax.f32 %v376_v8, 0.0 }
 0x1db   :  { %v383_v12 = vmax.f32 %v379_v10, 0.0 }
 0x1dd   :  { %v384_v13 = vpack.c.bf16 %v383_v12, %v382_v11 }
 0x1df   :  { %785 = vmatmul.mubr.bf16.vlgmr.msra.gmra.mrb[4].mxu0 %v384_v13 }
 0x2b2   :  { %v490_v17 = vpop.f32.mrb[4].mxu0 }
 0x2b3   :  { %v491_v18 = vadd.f32 %v708_v16, %v490_v17  ;;  %v786_v19 = vpop.f32.mrb[5].mxu0 }
 0x2b4   :  { %v493_v20 = vpop.f32.mrb[6].mxu0 }
 0x2b5   :  { %v494_v21 = vadd.f32 %v708_v16, %v493_v20  ;;  %v787_v22 = vpop.f32.mrb[7].mxu0  ;;  %v497_v23 = vmax.f32 %v491_v18, 0.0 }
 0x2b7   :  { %v498_v24 = vmax.f32 %v494_v21, 0.0 }
 0x2b9   :  { %v499_v25 = vpack.c.bf16 %v498_v24, %v497_v23 }
 0x2bb   :  { %797 = vmatmul.mubr.msk.bf16.vlgmr.msra.gmra.mrb[4].mxu1 %vm539_vm1, %v499_v25 }
 0x2bc   :  { %804 = vmatprep.mubr.msk.bf16.mxu1 %vm876_vm0, %v875_v34  ;;  %801 = vmatpush3.bf16.msra.mxu1 %v864_v26 }
 0x2bd   :  { %802 = vmatprep.subr.bf16.mxu1 %v875_v34 }
 0x2c0   :  { %803 = vmatpush3.bf16.msra.mxu1 %v865_v27 }
 0x38e   :  { %v577_v30 = vpop.f32.mrb[4].mxu1 }
 0x38f   :  { %v578_v31 = vadd.f32 %v717_v29, %v577_v30  ;;  %v798_v32 = vpop.f32.mrb[5].mxu1 }
 0x390   :  { %v580_v33 = vpop.f32.mrb[6].mxu1 }
 0x391   :  { %v581_v35 = vadd.f32 %v717_v29, %v580_v33  ;;  %v799_v34 = vpop.f32.mrb[7].mxu1  ;;  %v584_v36 = vmax.f32 %v578_v31, 0.0 }
 0x393   :  { %v585_v37 = vmax.f32 %v581_v35, 0.0 }
 0x395   :  { %v586_v38 = vpack.c.bf16 %v585_v37, %v584_v36 }
 0x397   :  { %805 = vmatmul.mubr.msk.bf16.vlgmr.msra.gmra.mrb[8].mxu1 %vm610_vm2, %v586_v38 }
 0x46a   :  { %v648_v40 = vpop.f32.mrb[8].mxu1 }
 0x46b   :  { %v649_v41 = vadd.f32 %v723_v39, %v648_v40  ;;  %v806_v42 = vpop.f32.mrb[9].mxu1 }
 0x46c   :  { %v651_v43 = vpop.f32.mrb[10].mxu1 }
 0x46d   :  { %v727_v44 = vmul.f32 -1.442695, %v649_v41  ;;  %v652_v45 = vadd.f32 %v723_v39, %v651_v43  ;;  %v807_v46 = vpop.f32.mrb[11].mxu1 }
 0x46f   :  { %866 = vpow2.f32 %v727_v44  ;;  %v728_v47 = vmul.f32 -1.442695, %v652_v45 }
 0x471   :  { %868 = vpow2.f32 %v728_v47 }
 0x479   :  { %v867_v48 = vpop.eup %866 }
 0x47a   :  { %v661_v49 = vadd.f32 1.0, %v867_v48 }
 0x47b   :  { %v869_v50 = vpop.eup %868 }
 0x47c   :  { %870 = vrcp.f32 %v661_v49  ;;  %v662_v51 = vadd.f32 1.0, %v869_v50 }
 0x47e   :  { %872 = vrcp.f32 %v662_v51 }
 0x486   :  { %v871_v52 = vpop.eup %870 }
 0x487   :  { %668 = vst.msk [vmem:[%s1130_s11] sm:$0xff] %vm667_vm3, %v871_v52 }
 0x488   :  { %v873_v53 = vpop.eup %872 }
 0x489   :  { %669 = vst.msk [vmem:[%s1130_s11 + $0x8] sm:$0xff] %vm667_vm3, %v873_v53 }

</bundles_post_ra>
